<compile_context>
chip_gen: v6e
topology: v6e:2x2x1
jax: 0.10.0
libtpu: 0.0.40
codegen_flags: <defaults>
</compile_context>

<pallas_src>
import math

import jax
import jax.numpy as jnp
from jax.experimental import pallas as pl
from jax.experimental.pallas import tpu as pltpu

_LANE = 128


def _layerscale_kernel(x_ref, g_ref, o_ref):
    # x_ref: (TM, TD), g_ref: (1, TD) -> broadcast multiply on the VPU.
    o_ref[...] = x_ref[...] * g_ref[...]


def _sublane_multiple(dtype) -> int:
    # Sub-32-bit dtypes pack along sublanes: 8 for 4B, 16 for 2B, 32 for 1B.
    return max(8, 32 // max(1, jnp.dtype(dtype).itemsize))


def _vmem_physical_bytes() -> int:
    try:
        return int(pltpu.get_tpu_info().vmem_capacity_bytes)
    except Exception:
        return 64 * 1024 * 1024  # conservative (v7x per-TC physical)


def layer_scale(x: jax.Array, gamma: jax.Array) -> jax.Array:
    """LayerScale forward: x * gamma, gamma broadcast over the last dim of x."""
    orig_shape = x.shape
    D = orig_shape[-1]
    R = math.prod(orig_shape[:-1])

    # Match PyTorch promotion semantics of `x * self.gamma`.
    out_dtype = jnp.result_type(x.dtype, gamma.dtype)

    x2 = x.reshape(R, D)
    g = gamma.reshape(D).astype(out_dtype)

    x_item = jnp.dtype(x.dtype).itemsize
    o_item = jnp.dtype(out_dtype).itemsize
    sub = max(_sublane_multiple(x.dtype), _sublane_multiple(out_dtype))

    # ---- lane-dense fold: make trailing dim a multiple of 128 when possible.
    Reff, Deff = R, D
    if D % _LANE != 0:
        k = _LANE // math.gcd(D, _LANE)
        if k > 1 and R % k == 0:
            Reff, Deff = R // k, D * k
            x2 = x2.reshape(Reff, Deff)
            g = jnp.tile(g, k)
    g2 = g.reshape(1, Deff)

    # ---- generation-aware VMEM budget for the double-buffered pipeline.
    phys = _vmem_physical_bytes()
    budget = min(phys // 2, 28 * 1024 * 1024)  # in+out, double-buffered
    vmem_limit = int(min(phys - 8 * 1024 * 1024, budget + 4 * 1024 * 1024))

    pair_item = x_item + o_item  # bytes per element for one x tile + one out tile

    # ---- lane (D) tiling: keep full width unless even the minimum-height row
    #      tile would overflow the budget; then split D into 128-multiples.
    td = Deff
    if Deff > _LANE and 2 * sub * Deff * pair_item > budget:
        max_lanes = max(_LANE, (budget // (2 * sub * pair_item)) // _LANE * _LANE)
        td = max_lanes  # fallback: partial (masked) edge tile
        for cand in range(max_lanes, _LANE - 1, -_LANE):
            if Deff % cand == 0:
                td = cand  # prefer an exact divisor -> no masked edge tile
                break

    # ---- row tiling, rounded to the dtype's sublane packing.
    tm = max(sub, (budget // max(1, 2 * td * pair_item)) // sub * sub)
    if tm >= Reff:
        tm = Reff  # single full-height block (full-dim block is always legal)

    grid = (pl.cdiv(Reff, tm), pl.cdiv(Deff, td))

    cost = pl.CostEstimate(
        flops=R * D,
        transcendentals=0,
        bytes_accessed=R * D * (x_item + o_item) + D * o_item,
    )

    out2 = pl.pallas_call(
        _layerscale_kernel,
        out_shape=jax.ShapeDtypeStruct((Reff, Deff), out_dtype),
        grid_spec=pltpu.PrefetchScalarGridSpec(
            num_scalar_prefetch=0,
            grid=grid,
            in_specs=[
                pl.BlockSpec((tm, td), lambda i, j: (i, j)),  # x tile
                pl.BlockSpec((1, td), lambda i, j: (0, j)),   # gamma (shared rows)
            ],
            out_specs=pl.BlockSpec((tm, td), lambda i, j: (i, j)),
        ),
        compiler_params=pltpu.CompilerParams(
            dimension_semantics=("parallel", "parallel"),
            vmem_limit_bytes=vmem_limit,
        ),
        cost_estimate=cost,
    )(x2, g2)

    return out2.reshape(orig_shape)


if __name__ == "__main__":
    # Small demo shapes consistent with the module: (B, N, D) with D = dim.
    B, N, D = 2, 8, 32
    init_values = 1e-5

    key = jax.random.PRNGKey(0)
    x = jax.random.normal(key, (B, N, D), dtype=jnp.float32)

    # nn.Parameter(init_values * torch.ones(dim))
    gamma = init_values * jnp.ones((D,), dtype=jnp.float32)

    out = layer_scale(x, gamma)
    jax.block_until_ready(out)

    # Sanity check against plain-JAX reference (same semantics as x * self.gamma).
    ref = x * gamma
    assert out.shape == (B, N, D)
    assert out.dtype == ref.dtype
    assert jnp.allclose(out, ref, atol=1e-6, rtol=1e-6)

    print("KERNEL_OK")
</pallas_src>

<mosaic_0001>
module attributes {stable_mosaic.version = 11 : i64} {
  func.func @_layerscale_kernel(%arg0: i32, %arg1: i32, %arg2: memref<4x128xf32, #tpu.memory_space<vmem>>, %arg3: memref<1x128xf32, #tpu.memory_space<vmem>>, %arg4: memref<4x128xf32, #tpu.memory_space<vmem>>) attributes {dimension_semantics = [#tpu.dimension_semantics<parallel>, #tpu.dimension_semantics<parallel>], iteration_bounds = array<i64: 1, 1>, scalar_prefetch = 0 : i64, scratch_operands = 0 : i64, tpu.core_type = #tpu.core_type<tc>, window_params = [{transform_indices = @transform_0, window_bounds = array<i64: 4, 128>}, {transform_indices = @transform_1, window_bounds = array<i64: 1, 128>}, {transform_indices = @transform_2, window_bounds = array<i64: 4, 128>}]} {
    %c0 = arith.constant 0 : index
    %c0_0 = arith.constant 0 : index
    %0 = vector.load %arg2[%c0, %c0_0] : memref<4x128xf32, #tpu.memory_space<vmem>>, vector<4x128xf32>
    %c0_1 = arith.constant 0 : index
    %c0_2 = arith.constant 0 : index
    %1 = vector.load %arg3[%c0_1, %c0_2] : memref<1x128xf32, #tpu.memory_space<vmem>>, vector<1x128xf32>
    %2 = vector.broadcast %1 : vector<1x128xf32> to vector<4x128xf32>
    %3 = arith.mulf %0, %2 : vector<4x128xf32>
    %c0_3 = arith.constant 0 : index
    %c0_4 = arith.constant 0 : index
    %4 = vector.load %arg4[%c0_3, %c0_4] : memref<4x128xf32, #tpu.memory_space<vmem>>, vector<4x128xf32>
    tpu.vector_store %arg4[%c0_3, %c0_4], %3 {strides = array<i32>} : memref<4x128xf32, #tpu.memory_space<vmem>>, vector<4x128xf32>,
    return
  }
  func.func @transform_0(%arg0: i32, %arg1: i32) -> (i32, i32) {
    %c0_i32 = arith.constant 0 : i32
    return %arg0, %arg1 : i32, i32
  }
  func.func @transform_1(%arg0: i32, %arg1: i32) -> (i32, i32) {
    %c0_i32 = arith.constant 0 : i32
    %c0_i32_0 = arith.constant 0 : i32
    return %c0_i32, %arg1 : i32, i32
  }
  func.func @transform_2(%arg0: i32, %arg1: i32) -> (i32, i32) {
    %c0_i32 = arith.constant 0 : i32
    return %arg0, %arg1 : i32, i32
  }
}

</mosaic_0001>

<bundles_post_ra>
// kernel: tpu_custom_call.1
= control target key start
LH: loop header
LB: loop body
LE: loop exit
PB: predicated region body
PF: predicated region fallthrough
CT: control target
= control target key end

     0   :  { %7 = vsyncpa [#allocation3], 0  ;;  %s122_s0 = inlined_call_operand.hbm [shape: f32[4,128], index: 0, kind: input, shape index: {}]   ;;  %s123_s1 = inlined_call_operand.vmem [shape: f32[1,128], index: 1, kind: input, shape index: {}]   ;;  %s124_s2 = inlined_call_operand.hbm [shape: f32[4,128], index: 2, kind: output, shape index: {}]  }
   0x1   :  { %8 = vsyncpa [#allocation4], 0  ;;  %s96_s9 = smov [#allocation2]  }
   0x2   :  { %s15_s10 = sshll.u32 %s96_s9, 4  ;;  %s16_s10 = int_to_ptr.vmem [resolvable:$true] %s15_s10 }
   0x3   :  { %s60_s11 = scalar_lea.vmem %s16_s10, 64  ;;  %p65_p1 = scmp.lt.s32.totalorder %s16_s10, %s16_s10 }
   0x4   :  { %p61_p0 = scmp.ne.s32.totalorder %s16_s10, %s60_s11  ;;  %p66_p2 = scmp.lt.s32.totalorder %s60_s11, %s60_s11 }
   0x6   :  { %p67_p3 = por %p66_p2, %p65_p1 }
   0x8   :  { %p68_p4 = pnand %p67_p3, %p61_p0 }
   0xa   :  { %71 = shalt.err (!%p68_p4)
}
   0xb   :  { %18 = dma.hbm_to_vmem [thread:$0]  %s122_s0, 64, %s16_s10, [#allocation3]  }
   0xc   :  { %92 = dma.done.wait [#allocation3], 64  }
   0xd   :  { %93 = vsyncadd [#allocation3], 4294967232  ;;  %s97_s14 = smov [#allocation5]   ;;  %v24_v0 = vld [vmem:[#allocation2] sm:$0xf] }
   0xe   :  { %s40_s15 = sshll.u32 %s97_s14, 4  ;;  %v49_v1 = vld [vmem:[%s123_s1] ss:$0 sm:$0xff]  ;;  %s41_s15 = int_to_ptr.vmem [resolvable:$true] %s40_s15 }
   0xf   :  { %v32_v2 = vmul.f32 %v49_v1, %v24_v0  ;;  %s72_s18 = scalar_lea.vmem %s41_s15, 64  ;;  %p77_p6 = scmp.lt.s32.totalorder %s41_s15, %s41_s15 }
  0x10   :  { %p73_p5 = scmp.ne.s32.totalorder %s41_s15, %s72_s18  ;;  %p78_p7 = scmp.lt.s32.totalorder %s72_s18, %s72_s18 }
  0x11   :  { %33 = vst [vmem:[#allocation5] sm:$0xf] %v32_v2 }
  0x12   :  { %p79_p8 = por %p78_p7, %p77_p6 }
  0x14   :  { %p80_p9 = pnand %p79_p8, %p73_p5 }
  0x16   :  { %83 = shalt.err (!%p80_p9)
}
  0x17   :  { %43 = dma.vmem_to_hbm [thread:$0]  %s41_s15, 64, %s124_s2, [#allocation4]  }
  0x18   :  { %94 = dma.done.wait [#allocation4], 64  }
  0x19   :  { %95 = vsyncadd [#allocation4], 4294967232 }
  0x1a   :  { %47 = vsyncpa [#allocation3], 1 }
  0x1b   :  { %48 = vsyncpa [#allocation4], 1 }

</bundles_post_ra>
